<compile_context>
chip_gen: v7x
topology: tpu7x:2x2x1
jax: 0.10.0
libtpu: 0.0.40
codegen_flags: <defaults>
</compile_context>

<pallas_src>
import jax
import jax.numpy as jnp
from jax.experimental import pallas as pl
from jax.experimental.pallas import tpu as pltpu

# ---------------- model dimensions (small, consistent with the module) -------
CAT_DIM = 16        # categorical_encoder.encode_output_dim
SC_DIM = 16         # scalar_encoder.encode_output_dim
TEXT_DIM = 32       # BiLSTMAttention.output_size (overview / tagline / title)
IMG_DIM = 32        # image_encoder.output_size
ENC_DIM = CAT_DIM + SC_DIM + 3 * TEXT_DIM + IMG_DIM          # encoder_output_dim = 160
L1_DIM = int(ENC_DIM ** 1.25)                                # l1_out_dim = 569
L2_DIM = int(L1_DIM ** 0.75)                                 # l2_out_dim = 116
BN_EPS = 1e-5
RRELU_SLOPE = (1.0 / 8.0 + 1.0 / 3.0) / 2.0                  # RReLU eval slope

# lane-aligned padded hidden dims (zero-padded; padding provably contributes 0)
L1_PAD = 640         # 569 -> 640
L2_PAD = 128         # 116 -> 128
OUT_ROWS = 8         # transposed output: 8 sublanes, row 0 is the real output


def _round_up(n, m):
    return ((n + m - 1) // m) * m


# ------------------------------- Pallas kernel --------------------------------
def mlp_head_kernel(x_ref, w1_ref, b1_ref, scp_ref, scn_ref, sh_ref,
                    w2_ref, b2_ref, w3t_ref, out_ref):
    # x: (TB, 160) bf16 (cast host-side); weights bf16; all accumulation f32.
    x = x_ref[...]

    # linear1: Linear -> RReLU(eval) -> folded BatchNorm1d(eval) -> Dropout(id)
    z1 = jnp.dot(x, w1_ref[...], preferred_element_type=jnp.float32) + b1_ref[...]
    h1 = z1 * jnp.where(z1 >= 0.0, scp_ref[...], scn_ref[...]) + sh_ref[...]

    # linear2: Linear -> RReLU(eval)
    z2 = jnp.dot(h1.astype(jnp.bfloat16), w2_ref[...],
                 preferred_element_type=jnp.float32) + b2_ref[...]
    h2 = jnp.where(z2 >= 0.0, z2, RRELU_SLOPE * z2)

    # linear_last emitted transposed: (8, TB), row 0 is the single real output
    # column (bias is a scalar, added on the tiny sliced result in the wrapper).
    out_ref[...] = jnp.einsum('od,bd->ob', w3t_ref[...], h2.astype(jnp.bfloat16),
                              preferred_element_type=jnp.float32)


def mlp_head(encoder_feats, fparams):
    """encoder_feats: tuple of (B, d_i) f32 features; returns (B, 1) f32."""
    B = encoder_feats[0].shape[0]

    # Batch tile: >=2 grid steps once B >= 512 (shards across v7x's 2 TCs via
    # the "parallel" axis); single full-array block for small B.
    if B <= 256:
        TB = _round_up(max(B, 1), 16)          # bf16 sublane packing multiple
        B_pad = TB
    else:
        TB = 512 if B >= 1024 else 256
        B_pad = _round_up(B, TB)

    # Build the bf16 activation buffer directly from the encoder features
    # (no intermediate f32 concat kept around); K stays 160 (un-padded lanes).
    x = jnp.concatenate([f.astype(jnp.bfloat16) for f in encoder_feats], axis=1)
    assert x.shape[1] == ENC_DIM
    if B_pad > B:
        x = jnp.concatenate(
            [x, jnp.zeros((B_pad - B, ENC_DIM), jnp.bfloat16)], axis=0)

    w1, b1, scp, scn, sh, w2, b2, w3t, b3 = fparams

    def const_spec(a):
        # weights / per-column vectors: same block every grid step -> VMEM-resident
        return pl.BlockSpec(a.shape, lambda i: (0, 0))

    out_t = pl.pallas_call(
        mlp_head_kernel,
        out_shape=jax.ShapeDtypeStruct((OUT_ROWS, B_pad), jnp.float32),
        grid=(B_pad // TB,),
        in_specs=[pl.BlockSpec((TB, ENC_DIM), lambda i: (i, 0))]
                 + [const_spec(a) for a in (w1, b1, scp, scn, sh, w2, b2, w3t)],
        out_specs=pl.BlockSpec((OUT_ROWS, TB), lambda i: (0, i)),
        compiler_params=pltpu.CompilerParams(
            dimension_semantics=("parallel",)),
    )(x, w1, b1, scp, scn, sh, w2, b2, w3t)

    # row 0 = real output; padded rows [B:B_pad) are garbage and sliced off here.
    return (out_t[0, :B] + b3).reshape(B, 1)


# ----------------------------- parameter setup --------------------------------
def init_params(key):
    """Logical-size params mimicking PyTorch defaults (U(-1/sqrt(fan_in), +))."""
    ks = jax.random.split(key, 8)

    def linear(k, fan_in, fan_out):
        kw, kb = jax.random.split(k)
        bound = 1.0 / jnp.sqrt(fan_in)
        # stored pre-transposed: (fan_in, fan_out) so kernel does x @ W
        w = jax.random.uniform(kw, (fan_in, fan_out), jnp.float32, -bound, bound)
        b = jax.random.uniform(kb, (1, fan_out), jnp.float32, -bound, bound)
        return w, b

    w1, b1 = linear(ks[0], ENC_DIM, L1_DIM)
    w2, b2 = linear(ks[1], L1_DIM, L2_DIM)
    w3, b3 = linear(ks[2], L2_DIM, 1)
    # non-trivial BN running stats so the host-side fold is actually exercised
    return {
        "w1": w1, "b1": b1,
        "bn_gamma": jax.random.uniform(ks[3], (1, L1_DIM), jnp.float32, 0.5, 1.5),
        "bn_beta": jax.random.uniform(ks[4], (1, L1_DIM), jnp.float32, -0.5, 0.5),
        "bn_mean": jax.random.uniform(ks[5], (1, L1_DIM), jnp.float32, -0.5, 0.5),
        "bn_var": jax.random.uniform(ks[6], (1, L1_DIM), jnp.float32, 0.5, 1.5),
        "w2": w2, "b2": b2,
        "w3": w3, "b3": b3,
    }


def fold_and_pad_params(p):
    """Fold BN (+RReLU slope) into scale/shift, zero-pad hidden dims, cast W bf16."""
    scale = p["bn_gamma"] * jax.lax.rsqrt(p["bn_var"] + BN_EPS)
    shift = p["bn_beta"] - p["bn_mean"] * scale

    def pad2(a, rows, cols, dtype=None):
        out = jnp.zeros((rows, cols), a.dtype).at[:a.shape[0], :a.shape[1]].set(a)
        return out.astype(dtype) if dtype is not None else out

    w1 = pad2(p["w1"], ENC_DIM, L1_PAD, jnp.bfloat16)   # K=160 left un-padded
    b1 = pad2(p["b1"], 1, L1_PAD)
    scp = pad2(scale, 1, L1_PAD)                        # positive-branch scale
    scn = pad2(scale * RRELU_SLOPE, 1, L1_PAD)          # negative-branch scale
    sh = pad2(shift, 1, L1_PAD)                         # padded cols -> h1 == 0
    w2 = pad2(p["w2"], L1_PAD, L2_PAD, jnp.bfloat16)
    b2 = pad2(p["b2"], 1, L2_PAD)
    # last layer stored transposed (8, L2_PAD); row 0 is the real weight vector
    w3t = pad2(p["w3"].T, OUT_ROWS, L2_PAD, jnp.bfloat16)
    b3 = p["b3"][0, 0]                                  # scalar, added in wrapper
    return (w1, b1, scp, scn, sh, w2, b2, w3t, b3)


def main_model_forward(encoder_feats, fparams):
    # out = torch.cat((cat_h, sc_h, overview_h, tagline_h, title_h, poster_h), dim=1)
    # followed by linear1 -> linear2 -> linear_last, fused in the Pallas kernel.
    return mlp_head(encoder_feats, fparams)


# ------------------------------------ main -------------------------------------
if __name__ == "__main__":
    B = 2
    key = jax.random.PRNGKey(0)
    k_p, k_cat, k_sc, k_ov, k_tg, k_ti, k_im = jax.random.split(key, 7)

    params = init_params(k_p)
    fparams = fold_and_pad_params(params)

    # Stand-in encoder outputs (see TODO above): one feature tensor per branch.
    cat_h = jax.random.normal(k_cat, (B, CAT_DIM), jnp.float32)
    sc_h = jax.random.normal(k_sc, (B, SC_DIM), jnp.float32)
    overview_h = jax.random.normal(k_ov, (B, TEXT_DIM), jnp.float32)
    tagline_h = jax.random.normal(k_tg, (B, TEXT_DIM), jnp.float32)
    title_h = jax.random.normal(k_ti, (B, TEXT_DIM), jnp.float32)
    poster_h = jax.random.normal(k_im, (B, IMG_DIM), jnp.float32)

    feats = (cat_h, sc_h, overview_h, tagline_h, title_h, poster_h)
    out = main_model_forward(feats, fparams)
    out = jax.block_until_ready(out)

    # Reference check in plain JAX (same eval-mode math, same bf16 casts,
    # unpadded logical shapes; folded BN/RReLU is algebraically identical to
    # eval BN after LeakyReLU).  Note: bf16 weights/activations deviate from the
    # f32 PyTorch model at the ~1e-3 level.
    x32 = jnp.concatenate(feats, axis=1)
    scale = params["bn_gamma"] * jax.lax.rsqrt(params["bn_var"] + BN_EPS)
    shift = params["bn_beta"] - params["bn_mean"] * scale

    z1 = jnp.dot(x32.astype(jnp.bfloat16), params["w1"].astype(jnp.bfloat16),
                 preferred_element_type=jnp.float32) + params["b1"]
    h1 = z1 * jnp.where(z1 >= 0, scale, scale * RRELU_SLOPE) + shift
    z2 = jnp.dot(h1.astype(jnp.bfloat16), params["w2"].astype(jnp.bfloat16),
                 preferred_element_type=jnp.float32) + params["b2"]
    h2 = jnp.where(z2 >= 0, z2, RRELU_SLOPE * z2)
    ref = jnp.dot(h2.astype(jnp.bfloat16), params["w3"].astype(jnp.bfloat16),
                  preferred_element_type=jnp.float32) + params["b3"]

    assert out.shape == (B, 1), out.shape
    assert jnp.allclose(out, ref, atol=1e-3, rtol=1e-3), (out, ref)
    print("KERNEL_OK")
</pallas_src>

<mosaic_0001>
module attributes {stable_mosaic.version = 11 : i64} {
  func.func @mlp_head_kernel(%arg0: i32, %arg1: memref<16x160xbf16, #tpu.memory_space<vmem>>, %arg2: memref<160x640xbf16, #tpu.memory_space<vmem>>, %arg3: memref<1x640xf32, #tpu.memory_space<vmem>>, %arg4: memref<1x640xf32, #tpu.memory_space<vmem>>, %arg5: memref<1x640xf32, #tpu.memory_space<vmem>>, %arg6: memref<1x640xf32, #tpu.memory_space<vmem>>, %arg7: memref<640x128xbf16, #tpu.memory_space<vmem>>, %arg8: memref<1x128xf32, #tpu.memory_space<vmem>>, %arg9: memref<8x128xbf16, #tpu.memory_space<vmem>>, %arg10: memref<8x16xf32, #tpu.memory_space<vmem>>) attributes {dimension_semantics = [#tpu.dimension_semantics<parallel>], iteration_bounds = array<i64: 1>, scalar_prefetch = 0 : i64, scratch_operands = 0 : i64, tpu.core_type = #tpu.core_type<tc>, window_params = [{transform_indices = @transform_0, window_bounds = array<i64: 16, 160>}, {pipeline_mode = #tpu.pipeline_mode<synchronous>, transform_indices = @transform_1, window_bounds = array<i64: 160, 640>}, {pipeline_mode = #tpu.pipeline_mode<synchronous>, transform_indices = @transform_2, window_bounds = array<i64: 1, 640>}, {pipeline_mode = #tpu.pipeline_mode<synchronous>, transform_indices = @transform_3, window_bounds = array<i64: 1, 640>}, {pipeline_mode = #tpu.pipeline_mode<synchronous>, transform_indices = @transform_4, window_bounds = array<i64: 1, 640>}, {pipeline_mode = #tpu.pipeline_mode<synchronous>, transform_indices = @transform_5, window_bounds = array<i64: 1, 640>}, {pipeline_mode = #tpu.pipeline_mode<synchronous>, transform_indices = @transform_6, window_bounds = array<i64: 640, 128>}, {pipeline_mode = #tpu.pipeline_mode<synchronous>, transform_indices = @transform_7, window_bounds = array<i64: 1, 128>}, {pipeline_mode = #tpu.pipeline_mode<synchronous>, transform_indices = @transform_8, window_bounds = array<i64: 8, 128>}, {transform_indices = @transform_9, window_bounds = array<i64: 8, 16>}]} {
    %c0 = arith.constant 0 : index
    %c0_0 = arith.constant 0 : index
    %0 = vector.load %arg1[%c0, %c0_0] : memref<16x160xbf16, #tpu.memory_space<vmem>>, vector<16x160xbf16>
    %c0_1 = arith.constant 0 : index
    %c0_2 = arith.constant 0 : index
    %1 = vector.load %arg2[%c0_1, %c0_2] : memref<160x640xbf16, #tpu.memory_space<vmem>>, vector<160x640xbf16>
    %cst = arith.constant dense<0.000000e+00> : vector<16x640xf32>
    %2 = tpu.matmul %0, %1, %cst {dimension_numbers = #tpu.dot_dimension_numbers<[1], [0], [0], [1], [0, 0, 1, 1], [], []>} : vector<16x160xbf16>, vector<160x640xbf16>, vector<16x640xf32> -> vector<16x640xf32>
    %c0_3 = arith.constant 0 : index
    %c0_4 = arith.constant 0 : index
    %3 = vector.load %arg3[%c0_3, %c0_4] : memref<1x640xf32, #tpu.memory_space<vmem>>, vector<1x640xf32>
    %4 = vector.broadcast %3 : vector<1x640xf32> to vector<16x640xf32>
    %5 = arith.addf %2, %4 : vector<16x640xf32>
    %cst_5 = arith.constant 0.000000e+00 : f32
    %6 = vector.broadcast %cst_5 : f32 to vector<16x640xf32>
    %7 = arith.cmpf oge, %5, %6 : vector<16x640xf32>
    %c0_6 = arith.constant 0 : index
    %c0_7 = arith.constant 0 : index
    %8 = vector.load %arg4[%c0_6, %c0_7] : memref<1x640xf32, #tpu.memory_space<vmem>>, vector<1x640xf32>
    %c0_8 = arith.constant 0 : index
    %c0_9 = arith.constant 0 : index
    %9 = vector.load %arg5[%c0_8, %c0_9] : memref<1x640xf32, #tpu.memory_space<vmem>>, vector<1x640xf32>
    %10 = vector.shape_cast %8 : vector<1x640xf32> to vector<1x640xf32>
    %11 = vector.broadcast %10 : vector<1x640xf32> to vector<16x640xf32>
    %12 = vector.shape_cast %9 : vector<1x640xf32> to vector<1x640xf32>
    %13 = vector.broadcast %12 : vector<1x640xf32> to vector<16x640xf32>
    %14 = arith.select %7, %11, %13 : vector<16x640xi1>, vector<16x640xf32>
    %15 = arith.mulf %5, %14 : vector<16x640xf32>
    %c0_10 = arith.constant 0 : index
    %c0_11 = arith.constant 0 : index
    %16 = vector.load %arg6[%c0_10, %c0_11] : memref<1x640xf32, #tpu.memory_space<vmem>>, vector<1x640xf32>
    %17 = vector.broadcast %16 : vector<1x640xf32> to vector<16x640xf32>
    %18 = arith.addf %15, %17 : vector<16x640xf32>
    %19 = arith.truncf %18 : vector<16x640xf32> to vector<16x640xbf16>
    %c0_12 = arith.constant 0 : index
    %c0_13 = arith.constant 0 : index
    %20 = vector.load %arg7[%c0_12, %c0_13] : memref<640x128xbf16, #tpu.memory_space<vmem>>, vector<640x128xbf16>
    %cst_14 = arith.constant dense<0.000000e+00> : vector<16x128xf32>
    %21 = tpu.matmul %19, %20, %cst_14 {dimension_numbers = #tpu.dot_dimension_numbers<[1], [0], [0], [1], [0, 0, 1, 1], [], []>} : vector<16x640xbf16>, vector<640x128xbf16>, vector<16x128xf32> -> vector<16x128xf32>
    %c0_15 = arith.constant 0 : index
    %c0_16 = arith.constant 0 : index
    %22 = vector.load %arg8[%c0_15, %c0_16] : memref<1x128xf32, #tpu.memory_space<vmem>>, vector<1x128xf32>
    %23 = vector.broadcast %22 : vector<1x128xf32> to vector<16x128xf32>
    %24 = arith.addf %21, %23 : vector<16x128xf32>
    %cst_17 = arith.constant 0.000000e+00 : f32
    %25 = vector.broadcast %cst_17 : f32 to vector<16x128xf32>
    %26 = arith.cmpf oge, %24, %25 : vector<16x128xf32>
    %cst_18 = arith.constant 0.229166672 : f32
    %27 = vector.broadcast %cst_18 : f32 to vector<16x128xf32>
    %28 = arith.mulf %27, %24 : vector<16x128xf32>
    %29 = arith.select %26, %24, %28 : vector<16x128xi1>, vector<16x128xf32>
    %c0_19 = arith.constant 0 : index
    %c0_20 = arith.constant 0 : index
    %30 = vector.load %arg9[%c0_19, %c0_20] : memref<8x128xbf16, #tpu.memory_space<vmem>>, vector<8x128xbf16>
    %31 = arith.truncf %29 : vector<16x128xf32> to vector<16x128xbf16>
    "tpu.trace_start"() <{level = 10 : i32, message = "od,bd->ob"}> : () -> ()
    %cst_21 = arith.constant dense<0.000000e+00> : vector<8x16xf32>
    %32 = tpu.matmul %30, %31, %cst_21 {dimension_numbers = #tpu.dot_dimension_numbers<[1], [1], [0], [0], [0, 0, 1, 0], [], []>} : vector<8x128xbf16>, vector<16x128xbf16>, vector<8x16xf32> -> vector<8x16xf32>
    "tpu.trace_stop"() : () -> ()
    %c0_22 = arith.constant 0 : index
    %c0_23 = arith.constant 0 : index
    %33 = vector.load %arg10[%c0_22, %c0_23] : memref<8x16xf32, #tpu.memory_space<vmem>>, vector<8x16xf32>
    tpu.vector_store %arg10[%c0_22, %c0_23], %32 {strides = array<i32>} : memref<8x16xf32, #tpu.memory_space<vmem>>, vector<8x16xf32>,
    return
  }
  func.func @transform_0(%arg0: i32) -> (i32, i32) {
    %c0_i32 = arith.constant 0 : i32
    %c0_i32_0 = arith.constant 0 : i32
    return %arg0, %c0_i32 : i32, i32
  }
  func.func @transform_1(%arg0: i32) -> (i32, i32) {
    %c0_i32 = arith.constant 0 : i32
    %c0_i32_0 = arith.constant 0 : i32
    %c0_i32_1 = arith.constant 0 : i32
    return %c0_i32, %c0_i32_0 : i32, i32
  }
  func.func @transform_2(%arg0: i32) -> (i32, i32) {
    %c0_i32 = arith.constant 0 : i32
    %c0_i32_0 = arith.constant 0 : i32
    %c0_i32_1 = arith.constant 0 : i32
    return %c0_i32, %c0_i32_0 : i32, i32
  }
  func.func @transform_3(%arg0: i32) -> (i32, i32) {
    %c0_i32 = arith.constant 0 : i32
    %c0_i32_0 = arith.constant 0 : i32
    %c0_i32_1 = arith.constant 0 : i32
    return %c0_i32, %c0_i32_0 : i32, i32
  }
  func.func @transform_4(%arg0: i32) -> (i32, i32) {
    %c0_i32 = arith.constant 0 : i32
    %c0_i32_0 = arith.constant 0 : i32
    %c0_i32_1 = arith.constant 0 : i32
    return %c0_i32, %c0_i32_0 : i32, i32
  }
  func.func @transform_5(%arg0: i32) -> (i32, i32) {
    %c0_i32 = arith.constant 0 : i32
    %c0_i32_0 = arith.constant 0 : i32
    %c0_i32_1 = arith.constant 0 : i32
    return %c0_i32, %c0_i32_0 : i32, i32
  }
  func.func @transform_6(%arg0: i32) -> (i32, i32) {
    %c0_i32 = arith.constant 0 : i32
    %c0_i32_0 = arith.constant 0 : i32
    %c0_i32_1 = arith.constant 0 : i32
    return %c0_i32, %c0_i32_0 : i32, i32
  }
  func.func @transform_7(%arg0: i32) -> (i32, i32) {
    %c0_i32 = arith.constant 0 : i32
    %c0_i32_0 = arith.constant 0 : i32
    %c0_i32_1 = arith.constant 0 : i32
    return %c0_i32, %c0_i32_0 : i32, i32
  }
  func.func @transform_8(%arg0: i32) -> (i32, i32) {
    %c0_i32 = arith.constant 0 : i32
    %c0_i32_0 = arith.constant 0 : i32
    %c0_i32_1 = arith.constant 0 : i32
    return %c0_i32, %c0_i32_0 : i32, i32
  }
  func.func @transform_9(%arg0: i32) -> (i32, i32) {
    %c0_i32 = arith.constant 0 : i32
    %c0_i32_0 = arith.constant 0 : i32
    return %c0_i32, %arg0 : i32, i32
  }
}

</mosaic_0001>

<bundles_post_ra>
// kernel: tpu_custom_call.1
= control target key start
LH: loop header
LB: loop body
LE: loop exit
PB: predicated region body
PF: predicated region fallthrough
CT: control target
= control target key end

     0   :  { %14 = vsyncpa [#allocation3], 0  ;;  %s1843_s0 = inlined_call_operand.hbm [shape: bf16[16,160], index: 0, kind: input, shape index: {}]   ;;  %s1844_s1 = inlined_call_operand.hbm [shape: bf16[160,640], index: 1, kind: input, shape index: {}]   ;;  %s1845_s2 = inlined_call_operand.vmem [shape: f32[1,640], index: 2, kind: input, shape index: {}]   ;;  %s1846_s3 = inlined_call_operand.vmem [shape: f32[1,640], index: 3, kind: input, shape index: {}]   ;;  %s1847_s4 = inlined_call_operand.vmem [shape: f32[1,640], index: 4, kind: input, shape index: {}]   ;;  %s1848_s5 = inlined_call_operand.hbm [shape: f32[1,640], index: 5, kind: input, shape index: {}]   ;;  %s1849_s6 = inlined_call_operand.hbm [shape: bf16[640,128], index: 6, kind: input, shape index: {}]   ;;  %s1850_s7 = inlined_call_operand.vmem [shape: f32[1,128], index: 7, kind: input, shape index: {}]   ;;  %s1851_s8 = inlined_call_operand.vmem [shape: bf16[8,128], index: 8, kind: input, shape index: {}]   ;;  %s1852_s9 = inlined_call_operand.hbm [shape: f32[8,16], index: 9, kind: output, shape index: {}]  }
   0x1   :  { %15 = vsyncpa [#allocation6], 0 }
   0x2   :  { %16 = vsyncpa [#allocation9], 0 }
   0x3   :  { %17 = vsyncpa [#allocation4], 0  ;;  %s1641_s30 = smov [#allocation5]   ;;  %s1523_s13 = scalar_lea.hbm %s1844_s1, 6400 }
   0x4   :  { %s35_s10 = sshll.u32 %s1641_s30, 4  ;;  %p1524_p0 = scmp.ne.s32.totalorder %s1844_s1, %s1523_s13  ;;  %s36_s10 = int_to_ptr.vmem [resolvable:$true] %s35_s10 }
   0x5   :  { %p1527_p1 = scmp.lt.u32.totalorder %s1523_s13, %s1844_s1 }
   0x7   :  { %p1529_p2 = pnand %p1527_p1, %p1524_p0 }
   0x9   :  { %1532 = shalt.err (!%p1529_p2)
}
   0xa   :  { %s1533_s18 = scalar_lea.vmem %s36_s10, 6400  ;;  %p1538_p4 = scmp.lt.s32.totalorder %s36_s10, %s36_s10 }
   0xb   :  { %p1534_p3 = scmp.ne.s32.totalorder %s36_s10, %s1533_s18  ;;  %p1539_p5 = scmp.lt.s32.totalorder %s1533_s18, %s1533_s18 }
   0xd   :  { %p1540_p6 = por %p1539_p5, %p1538_p4 }
   0xf   :  { %p1541_p7 = pnand %p1540_p6, %p1534_p3 }
  0x11   :  { %1544 = shalt.err (!%p1541_p7)
}
  0x12   :  { %s1642_s19 = smov 320   ;;  %s1643_s20 = smov 20  }
  0x13   :  { %41 = dma.hbm_to_vmem [thread:$0]  %s1844_s1, 6400, %s36_s10, [#allocation6], %s1642_s19, %s1642_s19, %s1643_s20  }
  0x14   :  { %s1644_s23 = smov [#allocation2]   ;;  %s1545_s27 = scalar_lea.hbm %s1843_s0, 256 }
  0x15   :  { %s23_s24 = sshll.u32 %s1644_s23, 4  ;;  %p1546_p8 = scmp.ne.s32.totalorder %s1843_s0, %s1545_s27  ;;  %s24_s24 = int_to_ptr.vmem [resolvable:$true] %s23_s24 }
  0x16   :  { %p1549_p9 = scmp.lt.u32.totalorder %s1545_s27, %s1843_s0 }
  0x18   :  { %p1551_p10 = pnand %p1549_p9, %p1546_p8 }
  0x1a   :  { %1554 = shalt.err (!%p1551_p10)
}
  0x1b   :  { %s1555_s12 = scalar_lea.vmem %s24_s24, 256  ;;  %p1560_p12 = scmp.lt.s32.totalorder %s24_s24, %s24_s24 }
  0x1c   :  { %p1556_p11 = scmp.ne.s32.totalorder %s24_s24, %s1555_s12  ;;  %p1561_p13 = scmp.lt.s32.totalorder %s1555_s12, %s1555_s12 }
  0x1e   :  { %p1562_p0 = por %p1561_p13, %p1560_p12 }
  0x20   :  { %p1563_p1 = pnand %p1562_p0, %p1556_p11 }
  0x22   :  { %1566 = shalt.err (!%p1563_p1)
}
  0x23   :  { %s1645_s1 = smov 128   ;;  %s1646_s10 = smov 8  }
  0x24   :  { %29 = dma.hbm_to_vmem [thread:$0]  %s1843_s0, 256, %s24_s24, [#allocation3], %s1645_s1, %s1645_s1, %s1646_s10  }
  0x25   :  { %s1647_s15 = smov [#allocation7]   ;;  %s1648_s17 = smov [#allocation8]  }
  0x26   :  { %s54_s16 = sshll.u32 %s1647_s15, 4  ;;  %s63_s18 = sshll.u32 %s1648_s17, 4  ;;  %s55_s16 = int_to_ptr.vmem [resolvable:$true] %s54_s16  ;;  %s1729_s18 = int_to_ptr.vmem [resolvable:$true] %s63_s18 }
  0x27   :  { %s1567_s21 = scalar_lea.hbm %s1848_s5, 80 }
  0x28   :  { %p1568_p2 = scmp.ne.s32.totalorder %s1848_s5, %s1567_s21  ;;  %p1571_p3 = scmp.lt.u32.totalorder %s1567_s21, %s1848_s5 }
  0x2a   :  { %p1573_p4 = pnand %p1571_p3, %p1568_p2 }
  0x2c   :  { %1576 = shalt.err (!%p1573_p4)
}
  0x2d   :  { %s1577_s0 = scalar_lea.vmem %s55_s16, 80  ;;  %s1581_s24 = scalar_lea.vmem %s55_s16, 96 }
  0x2e   :  { %p1578_p5 = scmp.ne.s32.totalorder %s55_s16, %s1577_s0  ;;  %p1582_p6 = scmp.lt.s32.totalorder %s55_s16, %s55_s16 }
  0x2f   :  { %p1583_p7 = scmp.lt.s32.totalorder %s1581_s24, %s1577_s0 }
  0x31   :  { %p1584_p8 = por %p1583_p7, %p1582_p6 }
  0x33   :  { %p1585_p9 = pnand %p1584_p8, %p1578_p5 }
  0x35   :  { %1588 = shalt.err (!%p1585_p9)
}
  0x36   :  { %57 = dma.hbm_to_vmem [thread:$0]  %s1848_s5, 80, %s55_s16, [#allocation6]  }
  0x37   :  { %s1589_s11 = scalar_lea.hbm %s1849_s6, 5120 }
  0x38   :  { %p1590_p10 = scmp.ne.s32.totalorder %s1849_s6, %s1589_s11  ;;  %p1593_p11 = scmp.lt.u32.totalorder %s1589_s11, %s1849_s6 }
  0x3a   :  { %p1595_p12 = pnand %p1593_p11, %p1590_p10 }
  0x3c   :  { %1598 = shalt.err (!%p1595_p12)
}
  0x3d   :  { %s1599_s14 = scalar_lea.vmem %s1729_s18, 5120  ;;  %p1604_p0 = scmp.lt.s32.totalorder %s1729_s18, %s1729_s18 }
  0x3e   :  { %p1600_p13 = scmp.ne.s32.totalorder %s1729_s18, %s1599_s14  ;;  %p1605_p1 = scmp.lt.s32.totalorder %s1599_s14, %s1599_s14 }
  0x40   :  { %p1606_p2 = por %p1605_p1, %p1604_p0 }
  0x42   :  { %p1607_p3 = pnand %p1606_p2, %p1600_p13 }
  0x44   :  { %1610 = shalt.err (!%p1607_p3)
}
  0x45   :  { %s1649_s5 = smov 64   ;;  %s1650_s15 = smov 4  }
  0x46   :  { %69 = dma.hbm_to_vmem [thread:$0]  %s1849_s6, 5120, %s1729_s18, [#allocation9], %s1649_s5, %s1649_s5, %s1650_s15  }
  0x47   :  { %1633 = dma.done.wait [#allocation3], 256  }
  0x48   :  { %1634 = vsyncadd [#allocation3], 4294967040 }
  0x49   :  { %1635 = dma.done.wait [#allocation6], 6480  }
  0x4a   :  { %1636 = vsyncadd [#allocation6], 4294960816 }
  0x4b   :  { %1637 = dma.done.wait [#allocation9], 5120  }
  0x4c   :  { %1638 = vsyncadd [#allocation9], 4294962176  ;;  %v1410_v0 = vld [vmem:[#allocation5 + $0x4] ss:$20 sps:$4 sm:$0xff]   ;;  %v1412_v1 = vld [vmem:[#allocation5] ss:$20 sps:$4 sm:$0xff]  }
  0x4d   :  { %449 = vmatprep.subr.bf16.mxu0 %v1410_v0  ;;  %v1413_v2 = vld [vmem:[#allocation5 + $0x2c] ss:$20 sps:$4 sm:$0xff]   ;;  %v1415_v3 = vld [vmem:[#allocation5 + $0x28] ss:$20 sps:$4 sm:$0xff]   ;;  %v1418_v5 = vld [vmem:[#allocation5 + $0x50] ss:$20 sps:$4 sm:$0xff]  }
  0x4e   :  { %450 = vmatpush1.bf16.msra.mxu0 %v1412_v1  ;;  %v1416_v4 = vld [vmem:[#allocation5 + $0x54] ss:$20 sps:$4 sm:$0xff]   ;;  %v1419_v6 = vld [vmem:[#allocation5 + $0x7c] ss:$20 sps:$4 sm:$0xff]   ;;  %v1421_v7 = vld [vmem:[#allocation5 + $0x78] ss:$20 sps:$4 sm:$0xff]  }
  0x4f   :  { %451 = vmatprep.subr.bf16.mxu0 %v1413_v2  ;;  %v1433_v8 = vld [vmem:[#allocation5 + $0xc] ss:$20 sps:$4 sm:$0xff]   ;;  %v1436_v9 = vld [vmem:[#allocation5 + $0x8] ss:$20 sps:$4 sm:$0xff]   ;;  %v1422_v10 = vld [vmem:[#allocation5 + $0xa4] ss:$20 sps:$4 sm:$0xff]  }
  0x50   :  { %492 = vmatprep.subr.bf16.mxu1 %v1433_v8  ;;  %v1439_v11 = vld [vmem:[#allocation5 + $0x34] ss:$20 sps:$4 sm:$0xff]   ;;  %v1442_v12 = vld [vmem:[#allocation5 + $0x30] ss:$20 sps:$4 sm:$0xff]   ;;  %v1425_v14 = vld [vmem:[#allocation5 + $0xcc] ss:$20 sps:$4 sm:$0xff]  }
  0x51   :  { %493 = vmatpush1.bf16.msra.mxu1 %v1436_v9  ;;  %v1424_v13 = vld [vmem:[#allocation5 + $0xa0] ss:$20 sps:$4 sm:$0xff]   ;;  %v1445_v15 = vld [vmem:[#allocation5 + $0x5c] ss:$20 sps:$4 sm:$0xff]   ;;  %vm445_vm0 = vcmask 261120   ;;  %v1651_v40 = vmov 0  }
  0x52   :  { %452 = vmatpush1.bf16.msra.mxu0 %v1415_v3  ;;  %494 = vmatprep.subr.bf16.mxu1 %v1439_v11  ;;  %v1448_v16 = vld [vmem:[#allocation5 + $0x58] ss:$20 sps:$4 sm:$0xff]   ;;  %v1449_v17 = vld [vmem:[#allocation2 + $0x4] ss:$8 sps:$4 sm:$0xff]   ;;  %v1430_v21 = vld [vmem:[#allocation5 + $0xf0] ss:$20 sps:$4 sm:$0xff]  }
  0x53   :  { %453 = vmatprep.subr.bf16.mxu0 %v1416_v4  ;;  %v1427_v18 = vld [vmem:[#allocation5 + $0xc8] ss:$20 sps:$4 sm:$0xff]   ;;  %v1452_v19 = vld [vmem:[#allocation5 + $0x84] ss:$20 sps:$4 sm:$0xff]   ;;  %1271 = vmatprep.mubr.msk.bf16.mxu0 %vm445_vm0, %v1449_v17  ;;  %v1454_v22 = vld [vmem:[#allocation5 + $0x80] ss:$20 sps:$4 sm:$0xff]  }
  0x54   :  { %v1428_v20 = vld [vmem:[#allocation5 + $0xf4] ss:$20 sps:$4 sm:$0xff]   ;;  %1272 = vmatprep.mubr.msk.bf16.mxu1 %vm445_vm0, %v1449_v17  ;;  %v1456_v23 = vld [vmem:[#allocation5 + $0xac] ss:$20 sps:$4 sm:$0xff]   ;;  %v1431_v24 = vld [vmem:[#allocation5 + $0x11c] ss:$20 sps:$4 sm:$0xff]  }
  0x55   :  { %495 = vmatpush1.bf16.msra.mxu1 %v1442_v12  ;;  %v1435_v25 = vld [vmem:[#allocation5 + $0x118] ss:$20 sps:$4 sm:$0xff]   ;;  %v1458_v26 = vld [vmem:[#allocation5 + $0xa8] ss:$20 sps:$4 sm:$0xff]   ;;  %v1462_v29 = vld [vmem:[#allocation5 + $0xd0] ss:$20 sps:$4 sm:$0xff]  }
  0x56   :  { %454 = vmatpush1.bf16.msra.mxu0 %v1418_v5  ;;  %496 = vmatprep.subr.bf16.mxu1 %v1445_v15  ;;  %v1460_v27 = vld [vmem:[#allocation5 + $0xd4] ss:$20 sps:$4 sm:$0xff]   ;;  %v1437_v28 = vld [vmem:[#allocation5 + $0x144] ss:$20 sps:$4 sm:$0xff]   ;;  %v1464_v31 = vld [vmem:[#allocation5 + $0xfc] ss:$20 sps:$4 sm:$0xff]   ;;  %v151_v15 = vlaneseq }
  0x57   :  { %455 = vmatprep.subr.bf16.mxu0 %v1419_v6  ;;  %v1441_v30 = vld [vmem:[#allocation5 + $0x140] ss:$20 sps:$4 sm:$0xff]   ;;  %v1447_v33 = vld [vmem:[#allocation5 + $0x168] ss:$20 sps:$4 sm:$0xff]   ;;  %v1466_v34 = vld [vmem:[#allocation5 + $0xf8] ss:$20 sps:$4 sm:$0xff]  }
  0x58   :  { %v1443_v32 = vld [vmem:[#allocation5 + $0x16c] ss:$20 sps:$4 sm:$0xff]   ;;  %v1468_v35 = vld [vmem:[#allocation5 + $0x124] ss:$20 sps:$4 sm:$0xff]   ;;  %v1474_v42 = vld [vmem:[#allocation5 + $0x148] ss:$20 sps:$4 sm:$0xff]  }
  0x59   :  { %497 = vmatpush1.bf16.msra.mxu1 %v1448_v16  ;;  %v1762_v36 = vld [vmem:[#allocation2] ss:$8 sps:$4 sm:$0xff]   ;;  %v1470_v38 = vld [vmem:[#allocation5 + $0x120] ss:$20 sps:$4 sm:$0xff]   ;;  %v1467_v48 = vld [vmem:[#allocation5 + $0x88] ss:$20 sps:$4 sm:$0xff]  }
  0x5a   :  { %456 = vmatpush1.bf16.msra.mxu0 %v1421_v7  ;;  %498 = vmatprep.subr.bf16.mxu1 %v1452_v19  ;;  %v1455_v37 = vld [vmem:[#allocation5 + $0x10] ss:$20 sps:$4 sm:$0xff]   ;;  %v1472_v39 = vld [vmem:[#allocation5 + $0x14c] ss:$20 sps:$4 sm:$0xff]   ;;  %v1476_v43 = vld [vmem:[#allocation5 + $0x174] ss:$20 sps:$4 sm:$0xff]  }
  0x5b   :  { %457 = vmatprep.subr.bf16.mxu0 %v1422_v10  ;;  %v1459_v41 = vld [vmem:[#allocation5 + $0x38] ss:$20 sps:$4 sm:$0xff]   ;;  %v1463_v44 = vld [vmem:[#allocation5 + $0x60] ss:$20 sps:$4 sm:$0xff]   ;;  %v1478_v45 = vld [vmem:[#allocation5 + $0x170] ss:$20 sps:$4 sm:$0xff]  }
  0x5c   :  { %v1483_v46 = vld [vmem:[#allocation8 + $0x40] sm:$0xff]   ;;  %v1485_v49 = vld [vmem:[#allocation8 + $0x48] sm:$0xff]   ;;  %v1487_v52 = vld [vmem:[#allocation8 + $0x50] sm:$0xff]   ;;  %v1652_v6 = vmov 0.0   ;;  %vm1653_vm1 = vmmov 0   ;;  %v1778_v16 = vshrl.u32 %v151_v15, 7 }
  0x5d   :  { %499 = vmatpush1.bf16.msra.mxu1 %v1454_v22  ;;  %v1484_v47 = vld [vmem:[#allocation8] sm:$0xff]   ;;  %v1486_v50 = vld [vmem:[#allocation8 + $0x8] sm:$0xff]   ;;  %v1488_v53 = vld [vmem:[#allocation8 + $0x10] sm:$0xff]   ;;  %s1654_s23 = smov [#allocation10]   ;;  %vm1200_vm14 = vcmask 130048  }
  0x5e   :  { %458 = vmatpush1.bf16.msra.mxu0 %v1424_v13  ;;  %500 = vmatprep.subr.bf16.mxu1 %v1456_v23  ;;  %v1471_v51 = vld [vmem:[#allocation5 + $0xb0] ss:$20 sps:$4 sm:$0xff]   ;;  %v1475_v54 = vld [vmem:[#allocation5 + $0xd8] ss:$20 sps:$4 sm:$0xff]   ;;  %v1479_v57 = vld [vmem:[#allocation5 + $0x100] ss:$20 sps:$4 sm:$0xff]  }
  0x5f   :  { %459 = vmatprep.subr.bf16.mxu0 %v1425_v14  ;;  %v1489_v55 = vld [vmem:[#allocation8 + $0x58] sm:$0xff]   ;;  %v1491_v58 = vld [vmem:[#allocation8 + $0x60] sm:$0xff]   ;;  %v1493_v63 = vld [vmem:[#allocation8 + $0x68] sm:$0xff]   ;;  %v157_v19 = vsub.s32 1, %v1778_v16  ;;  %s1208_s25 = sshll.u32 %s1654_s23, 4  ;;  %s1209_s25 = int_to_ptr.vmem [resolvable:$true] %s1208_s25 }
  0x60   :  { %v1490_v56 = vld [vmem:[#allocation8 + $0x18] sm:$0xff]   ;;  %v1492_v59 = vld [vmem:[#allocation8 + $0x20] sm:$0xff]   ;;  %v1494_v0 = vld [vmem:[#allocation8 + $0x28] sm:$0xff]   ;;  %s1611_s26 = scalar_lea.vmem %s1209_s25, 128  ;;  %p1616_p5 = scmp.lt.s32.totalorder %s1209_s25, %s1209_s25 }
  0x61   :  { %501 = vmatpush1.bf16.msra.mxu1 %v1458_v26  ;;  %v1480_v60 = vld [vmem:[#allocation5 + $0x128] ss:$20 sps:$4 sm:$0xff]   ;;  %v1481_v61 = vld [vmem:[#allocation5 + $0x150] ss:$20 sps:$4 sm:$0xff]   ;;  %v1482_v62 = vld [vmem:[#allocation5 + $0x178] ss:$20 sps:$4 sm:$0xff]   ;;  %p1612_p4 = scmp.ne.s32.totalorder %s1209_s25, %s1611_s26  ;;  %p1617_p6 = scmp.lt.s32.totalorder %s1611_s26, %s1611_s26 }
  0x62   :  { %460 = vmatpush1.bf16.msra.mxu0 %v1427_v18  ;;  %502 = vmatprep.subr.bf16.mxu1 %v1460_v27  ;;  %v1495_v1 = vld [vmem:[#allocation8 + $0x70] sm:$0xff]   ;;  %v1497_v3 = vld [vmem:[#allocation8 + $0x78] sm:$0xff]   ;;  %v1499_v5 = vld [vmem:[#allocation8 + $0xc0] sm:$0xff]  }
  0x63   :  { %461 = vmatprep.subr.bf16.mxu0 %v1428_v20  ;;  %v1496_v2 = vld [vmem:[#allocation8 + $0x30] sm:$0xff]   ;;  %v1498_v4 = vld [vmem:[#allocation8 + $0x38] sm:$0xff]   ;;  %v1504_v7 = vld [vmem:[#allocation8 + $0x100] sm:$0xff]   ;;  %p1618_p7 = por %p1617_p6, %p1616_p5 }
  0x64   :  { %v1507_v8 = vld [vmem:[#allocation8 + $0x108] sm:$0xff]   ;;  %v1510_v9 = vld [vmem:[#allocation8 + $0x110] sm:$0xff]   ;;  %v1513_v10 = vld [vmem:[#allocation8 + $0x118] sm:$0xff]  }
  0x65   :  { %503 = vmatpush1.bf16.msra.mxu1 %v1462_v29  ;;  %v1516_v11 = vld [vmem:[#allocation8 + $0x120] sm:$0xff]   ;;  %v1519_v12 = vld [vmem:[#allocation8 + $0x128] sm:$0xff]   ;;  %v1521_v13 = vld [vmem:[#allocation8 + $0x130] sm:$0xff]   ;;  %p1619_p8 = pnand %p1618_p7, %p1612_p4 }
  0x66   :  { %462 = vmatpush1.bf16.msra.mxu0 %v1430_v21  ;;  %504 = vmatprep.subr.bf16.mxu1 %v1464_v31  ;;  %v1522_v14 = vld [vmem:[#allocation8 + $0x138] sm:$0xff]  }
  0x67   :  { %463 = vmatprep.subr.bf16.mxu0 %v1431_v24  ;;  %v1784_v18 = vld [vmem:[%s1845_s2] sm:$0x1f] }
  0x68   :  { %v1791_v21 = vld [vmem:[%s1846_s3] sm:$0x1f]  ;;  %v158_v23 = vrot.slane %v1784_v18, %v157_v19 }
  0x69   :  { %505 = vmatpush1.bf16.msra.mxu1 %v1466_v34  ;;  %v1796_v22 = vld [vmem:[%s1847_s4] sm:$0x1f] }
  0x6a   :  { %464 = vmatpush1.bf16.msra.mxu0 %v1435_v25  ;;  %506 = vmatprep.subr.bf16.mxu1 %v1468_v35  ;;  %v1801_v27 = vld [vmem:[#allocation7] sm:$0x1f]  ;;  %v622_v31 = vrot.slane %v1796_v22, %v157_v19 }
  0x6b   :  { %465 = vmatprep.subr.bf16.mxu0 %v1437_v28 }
  0x6d   :  { %507 = vmatpush1.bf16.msra.mxu1 %v1470_v38 }
  0x6e   :  { %466 = vmatpush1.bf16.msra.mxu0 %v1441_v30  ;;  %508 = vmatprep.subr.bf16.mxu1 %v1472_v39  ;;  %v596_v30 = vrot.slane %v1791_v21, %v157_v19  ;;  %v161_v39 = vsub.s32 2, %v1778_v16 }
  0x6f   :  { %467 = vmatprep.subr.bf16.mxu0 %v1443_v32 }
  0x71   :  { %509 = vmatpush1.bf16.msra.mxu1 %v1474_v42  ;;  %v165_v42 = vsub.s32 3, %v1778_v16 }
  0x72   :  { %468 = vmatpush1.bf16.msra.mxu0 %v1447_v33  ;;  %510 = vmatprep.subr.bf16.mxu1 %v1476_v43 }
  0x73   :  { %535 = vmatprep.subr.bf16.mxu0 %v1651_v40 }
  0x75   :  { %482 = vmatmul.mubr.bf16.vlgmr.msra.gmra.mrb[0].mxu0 %v1762_v36  ;;  %511 = vmatpush1.bf16.msra.mxu1 %v1478_v45 }
  0x76   :  { %536 = vmatpush1.bf16.msra.mxu0 %v1455_v37  ;;  %1273 = vmatprep.mubr.msk.bf16.mxu0 %vm445_vm0, %v1449_v17  ;;  %v153_v17 = vsub.s32 0, %v1778_v16 }
  0x77   :  { %537 = vmatprep.subr.bf16.mxu0 %v1651_v40  ;;  %1315 = vmatprep.subr.bf16.mxu1 %v1483_v46 }
  0x78   :  { %525 = vmatmul.mubr.bf16.vlgmr.msra.gmra.mrb[0].mxu1 %v1762_v36  ;;  %v154_v20 = vrot.slane %v1784_v18, %v153_v17  ;;  %v592_v25 = vrot.slane %v1791_v21, %v153_v17  ;;  %v618_v26 = vrot.slane %v1796_v22, %v153_v17  ;;  %v665_v34 = vrot.slane %v1801_v27, %v153_v17 }
  0x79   :  { %1316 = vmatpush3.bf16.msra.mxu1 %v1484_v47 }
  0x7a   :  { %538 = vmatpush1.bf16.msra.mxu0 %v1459_v41  ;;  %1317 = vmatprep.subr.bf16.mxu1 %v1485_v49  ;;  %v162_v49 = vrot.slane %v1784_v18, %v161_v39 }
  0x7b   :  { %539 = vmatprep.subr.bf16.mxu0 %v1651_v40 }
  0x7d   :  { %1318 = vmatpush3.bf16.msra.mxu1 %v1486_v50 }
  0x7e   :  { %540 = vmatpush1.bf16.msra.mxu0 %v1463_v44  ;;  %1319 = vmatprep.subr.bf16.mxu1 %v1487_v52  ;;  %v669_v44 = vrot.slane %v1801_v27, %v157_v19  ;;  %v166_v52 = vrot.slane %v1784_v18, %v165_v42 }
  0x7f   :  { %541 = vmatprep.subr.bf16.mxu0 %v1651_v40 }
  0x81   :  { %1320 = vmatpush3.bf16.msra.mxu1 %v1488_v53 }
  0x82   :  { %542 = vmatpush1.bf16.msra.mxu0 %v1467_v48  ;;  %1321 = vmatprep.subr.bf16.mxu1 %v1489_v55 }
  0x83   :  { %543 = vmatprep.subr.bf16.mxu0 %v1651_v40 }
  0x85   :  { %1322 = vmatpush3.bf16.msra.mxu1 %v1490_v56 }
  0x86   :  { %544 = vmatpush1.bf16.msra.mxu0 %v1471_v51  ;;  %1323 = vmatprep.subr.bf16.mxu1 %v1491_v58  ;;  %v626_v58 = vrot.slane %v1796_v22, %v161_v39 }
  0x87   :  { %545 = vmatprep.subr.bf16.mxu0 %v1651_v40 }
  0x89   :  { %1324 = vmatpush3.bf16.msra.mxu1 %v1492_v59 }
  0x8a   :  { %546 = vmatpush1.bf16.msra.mxu0 %v1475_v54  ;;  %1325 = vmatprep.subr.bf16.mxu1 %v1493_v63  ;;  %v604_v63 = vrot.slane %v1791_v21, %v165_v42 }
  0x8b   :  { %547 = vmatprep.subr.bf16.mxu0 %v1651_v40 }
  0x8d   :  { %1326 = vmatpush3.bf16.msra.mxu1 %v1494_v0  ;;  %v630_v0 = vrot.slane %v1796_v22, %v165_v42 }
  0x8e   :  { %548 = vmatpush1.bf16.msra.mxu0 %v1479_v57  ;;  %1327 = vmatprep.subr.bf16.mxu1 %v1495_v1  ;;  %v600_v57 = vrot.slane %v1791_v21, %v161_v39  ;;  %v1501_v1 = vld [vmem:[#allocation8 + $0xc8] sm:$0xff]  }
  0x8f   :  { %549 = vmatprep.subr.bf16.mxu0 %v1651_v40 }
  0x91   :  { %1328 = vmatpush3.bf16.msra.mxu1 %v1496_v2 }
  0x92   :  { %550 = vmatpush1.bf16.msra.mxu0 %v1480_v60  ;;  %1329 = vmatprep.subr.bf16.mxu1 %v1497_v3  ;;  %v1500_v60 = vld [vmem:[#allocation8 + $0x80] sm:$0xff]  }
  0x93   :  { %551 = vmatprep.subr.bf16.mxu0 %v1651_v40 }
  0x95   :  { %1330 = vmatpush3.bf16.msra.mxu1 %v1498_v4  ;;  %v673_v4 = vrot.slane %v1801_v27, %v161_v39  ;;  %v169_v39 = vsub.s32 4, %v1778_v16 }
  0x96   :  { %552 = vmatpush1.bf16.msra.mxu0 %v1481_v61  ;;  %1337 = vmatprep.subr.bf16.mxu1 %v1499_v5 }
  0x97   :  { %553 = vmatprep.subr.bf16.mxu0 %v1651_v40 }
  0x9a   :  { %554 = vmatpush1.bf16.msra.mxu0 %v1482_v62 }
  0x9b   :  { %1370 = vmatprep.subr.bf16.mxu0 %v1652_v6 }
  0x9d   :  { %568 = vmatmul.mubr.bf16.vlgmr.msra.gmra.mrb[4].mxu0 %v1762_v36 }
  0x9e   :  { %1371 = vmatpush3.bf16.msra.mxu0 %v1504_v7  ;;  %1386 = vmatprep.mubr.msk.bf16.mxu0 %vm1653_vm1, %v1652_v6 }
  0x9f   :  { %1372 = vmatprep.subr.bf16.mxu0 %v1652_v6 }
  0xa2   :  { %1373 = vmatpush3.bf16.msra.mxu0 %v1507_v8 }
  0xa3   :  { %1374 = vmatprep.subr.bf16.mxu0 %v1652_v6 }
  0xa6   :  { %1375 = vmatpush3.bf16.msra.mxu0 %v1510_v9  ;;  %v677_v9 = vrot.slane %v1801_v27, %v165_v42  ;;  %v1518_v42 = vld [vmem:[#allocation8 + $0xf8] sm:$0xff]  }
  0xa7   :  { %1376 = vmatprep.subr.bf16.mxu0 %v1652_v6 }
  0xaa   :  { %1377 = vmatpush3.bf16.msra.mxu0 %v1513_v10 }
  0xab   :  { %1378 = vmatprep.subr.bf16.mxu0 %v1652_v6 }
  0xae   :  { %1379 = vmatpush3.bf16.msra.mxu0 %v1516_v11  ;;  %v1502_v11 = vld [vmem:[#allocation8 + $0x88] sm:$0xff]  }
  0xaf   :  { %1380 = vmatprep.subr.bf16.mxu0 %v1652_v6 }
  0xb2   :  { %1381 = vmatpush3.bf16.msra.mxu0 %v1519_v12 }
  0xb3   :  { %1382 = vmatprep.subr.bf16.mxu0 %v1652_v6 }
  0xb6   :  { %1383 = vmatpush3.bf16.msra.mxu0 %v1521_v13 }
  0xb7   :  { %1384 = vmatprep.subr.bf16.mxu0 %v1652_v6 }
  0xba   :  { %1385 = vmatpush3.bf16.msra.mxu0 %v1522_v14  ;;  %v1503_v14 = vld [vmem:[#allocation8 + $0xd0] sm:$0xff]  }
 0x148   :  { %v483_v24 = vpop.f32.mrb[0].mxu0 }
 0x149   :  { %v484_v28 = vadd.f32 %v483_v24, %v154_v20  ;;  %v485_v29 = vpop.f32.mrb[1].mxu0 }
 0x14a   :  { %v486_v32 = vadd.f32 %v485_v29, %v158_v23  ;;  %v487_v33 = vpop.f32.mrb[2].mxu0  ;;  %v1506_v29 = vld [vmem:[#allocation8 + $0xd8] sm:$0xff]  }
 0x14b   :  { %vm576_vm2 = vcmp.ge.f32.partialorder %v484_v28, 0.0  ;;  %v488_v35 = vadd.f32 %v487_v33, %v154_v20  ;;  %v489_v36 = vpop.f32.mrb[3].mxu0  ;;  %v526_v56 = vpop.f32.mrb[0].mxu1  ;;  %v1508_v33 = vld [vmem:[#allocation8 + $0x98] sm:$0xff]  }
 0x14c   :  { %v640_v37 = vsel %vm576_vm2, %v592_v25, %v618_v26  ;;  %vm577_vm3 = vcmp.ge.f32.partialorder %v486_v32, 0.0  ;;  %v490_v38 = vadd.f32 %v489_v36, %v158_v23  ;;  %v527_v61 = vadd.f32 %v526_v56, %v162_v49  ;;  %v528_v62 = vpop.f32.mrb[1].mxu1  ;;  %v1512_v36 = vld [vmem:[#allocation8 + $0xe8] sm:$0xff]  }
 0x14d   :  { %v650_v40 = vmul.f32 %v640_v37, %v484_v28  ;;  %v641_v41 = vsel %vm577_vm3, %v596_v30, %v622_v31  ;;  %vm581_vm4 = vcmp.ge.f32.partialorder %v488_v35, 0.0  ;;  %v529_v2 = vadd.f32 %v528_v62, %v166_v52  ;;  %v530_v3 = vpop.f32.mrb[2].mxu1  ;;  %v1514_v37 = vld [vmem:[#allocation8 + $0xa8] sm:$0xff]  }
 0x14e   :  { %v651_v43 = vmul.f32 %v641_v41, %v486_v32  ;;  %v645_v45 = vsel %vm581_vm4, %v592_v25, %v618_v26  ;;  %vm582_vm5 = vcmp.ge.f32.partialorder %v490_v38, 0.0  ;;  %vm578_vm6 = vcmp.ge.f32.partialorder %v527_v61, 0.0  ;;  %v532_v7 = vpop.f32.mrb[3].mxu1  ;;  %v1505_v26 = vld [vmem:[#allocation8 + $0x90] sm:$0xff]  }
 0x14f   :  { %v655_v46 = vmul.f32 %v645_v45, %v488_v35  ;;  %v646_v47 = vsel %vm582_vm5, %v596_v30, %v622_v31  ;;  %v687_v50 = vadd.f32 %v665_v34, %v650_v40  ;;  %v531_v5 = vadd.f32 %v530_v3, %v162_v49  ;;  %v1511_v35 = vld [vmem:[#allocation8 + $0xa0] sm:$0xff]   ;;  %v1517_v40 = vld [vmem:[#allocation8 + $0xb0] sm:$0xff]  }
 0x150   :  { %v656_v48 = vmul.f32 %v646_v47, %v490_v38  ;;  %v688_v53 = vadd.f32 %v669_v44, %v651_v43  ;;  %v642_v8 = vsel %vm578_vm6, %v600_v57, %v626_v58  ;;  %vm579_vm7 = vcmp.ge.f32.partialorder %v529_v2, 0.0  ;;  %v1515_v38 = vld [vmem:[#allocation8 + $0xf0] sm:$0xff]  }
 0x151   :  { %v692_v51 = vadd.f32 %v665_v34, %v655_v46  ;;  %v533_v10 = vadd.f32 %v532_v7, %v166_v52  ;;  %v652_v12 = vmul.f32 %v642_v8, %v527_v61  ;;  %v643_v13 = vsel %vm579_vm7, %v604_v63, %v630_v0  ;;  %v1509_v34 = vld [vmem:[#allocation8 + $0xe0] sm:$0xff]   ;;  %v1520_v46 = vld [vmem:[#allocation8 + $0xb8] sm:$0xff]  }
 0x152   :  { %v693_v54 = vadd.f32 %v669_v44, %v656_v48  ;;  %vm583_vm8 = vcmp.ge.f32.partialorder %v531_v5, 0.0  ;;  %v653_v15 = vmul.f32 %v643_v13, %v529_v2  ;;  %v170_v41 = vrot.slane %v1784_v18, %v169_v39 }
 0x153   :  { %v697_v55 = vpack.c.bf16 %v692_v51, %v687_v50  ;;  %v647_v17 = vsel %vm583_vm8, %v600_v57, %v626_v58  ;;  %vm584_vm9 = vcmp.ge.f32.partialorder %v533_v10, 0.0  ;;  %v689_v19 = vadd.f32 %v673_v4, %v652_v12 }
 0x154   :  { %v698_v59 = vpack.c.bf16 %v693_v54, %v688_v53  ;;  %v657_v20 = vmul.f32 %v647_v17, %v531_v5  ;;  %v648_v23 = vsel %vm584_vm9, %v604_v63, %v630_v0  ;;  %v690_v24 = vadd.f32 %v677_v9, %v653_v15 }
 0x155   :  { %v658_v25 = vmul.f32 %v648_v23, %v533_v10  ;;  %v608_v44 = vrot.slane %v1791_v21, %v169_v39  ;;  %v634_v45 = vrot.slane %v1796_v22, %v169_v39  ;;  %v681_v18 = vrot.slane %v1801_v27, %v169_v39  ;;  %v1274_v27 = vld [vmem:[%s1850_s7] ss:$0 sm:$0xff] }
 0x156   :  { %1061 = vmatprep.mubr.bf16.mxu1 %v698_v59  ;;  %v694_v28 = vadd.f32 %v673_v4, %v657_v20  ;;  %v1158_v23 = vld [vmem:[%s1851_s8] sm:$0xf] }
 0x157   :  { %1062 = vmatmul.mubr.bf16.vlgmr.msra.gmra.mrb[4].mxu1 %v697_v55  ;;  %v695_v30 = vadd.f32 %v677_v9, %v658_v25 }
 0x158   :  { %1338 = vmatpush3.bf16.msra.mxu1 %v1500_v60  ;;  %v699_v31 = vpack.c.bf16 %v694_v28, %v689_v19 }
 0x159   :  { %1339 = vmatprep.subr.bf16.mxu1 %v1501_v1  ;;  %v700_v32 = vpack.c.bf16 %v695_v30, %v690_v24 }
 0x15b   :  { %1102 = vmatprep.mubr.bf16.mxu1 %v700_v32 }
 0x15c   :  { %1340 = vmatpush3.bf16.msra.mxu1 %v1502_v11 }
 0x15d   :  { %1341 = vmatprep.subr.bf16.mxu1 %v1503_v14 }
 0x160   :  { %1342 = vmatpush3.bf16.msra.mxu1 %v1505_v26 }
 0x161   :  { %1343 = vmatprep.subr.bf16.mxu1 %v1506_v29 }
 0x164   :  { %1344 = vmatpush3.bf16.msra.mxu1 %v1508_v33 }
 0x165   :  { %1345 = vmatprep.subr.bf16.mxu1 %v1509_v34 }
 0x168   :  { %1346 = vmatpush3.bf16.msra.mxu1 %v1511_v35 }
 0x169   :  { %1347 = vmatprep.subr.bf16.mxu1 %v1512_v36 }
 0x16c   :  { %1348 = vmatpush3.bf16.msra.mxu1 %v1514_v37 }
 0x16d   :  { %1349 = vmatprep.subr.bf16.mxu1 %v1515_v38 }
 0x170   :  { %1350 = vmatpush3.bf16.msra.mxu1 %v1517_v40  ;;  %v569_v43 = vpop.f32.mrb[4].mxu0 }
 0x171   :  { %v570_v47 = vadd.f32 %v569_v43, %v170_v41  ;;  %v571_v48 = vpop.f32.mrb[5].mxu0  ;;  %1351 = vmatprep.subr.bf16.mxu1 %v1518_v42 }
 0x172   :  { %v572_v49 = vpop.f32.mrb[6].mxu0 }
 0x173   :  { %vm580_vm10 = vcmp.ge.f32.partialorder %v570_v47, 0.0  ;;  %v573_v50 = vadd.f32 %v572_v49, %v170_v41  ;;  %v574_v16 = vpop.f32.mrb[7].mxu0 }
 0x174   :  { %v644_v51 = vsel %vm580_vm10, %v608_v44, %v634_v45  ;;  %1352 = vmatpush3.bf16.msra.mxu1 %v1520_v46 }
 0x175   :  { %v654_v52 = vmul.f32 %v644_v51, %v570_v47  ;;  %vm585_vm11 = vcmp.ge.f32.partialorder %v573_v50, 0.0  ;;  %1390 = vmatprep.subr.bf16.mxu1 %v1652_v6 }
 0x176   :  { %v649_v53 = vsel %vm585_vm11, %v608_v44, %v634_v45 }
 0x177   :  { %v659_v21 = vmul.f32 %v649_v53, %v573_v50  ;;  %1103 = vmatmul.mubr.bf16.vlgmr.msra.gmra.mrb[8].mxu1 %v699_v31  ;;  %v691_v22 = vadd.f32 %v681_v18, %v654_v52 }
 0x178   :  { %1392 = vmatprep.mubr.msk.bf16.mxu1 %vm1653_vm1, %v1652_v6 }
 0x179   :  { %v696_v54 = vadd.f32 %v681_v18, %v659_v21 }
 0x17b   :  { %v701_v55 = vpack.c.bf16 %v696_v54, %v691_v22 }
 0x17d   :  { %1387 = vmatmul.mubr.bf16.vlgmr.msra.gmra.mrb[8].mxu0 %v701_v55 }
 0x22a   :  { %v1331_v56 = vpop.f32.mrb[4].mxu1 }
 0x22b   :  { %v1332_v57 = vpop.f32.mrb[5].mxu1 }
 0x22c   :  { %v1333_v58 = vadd.f32 %v1332_v57, %v1331_v56  ;;  %v1334_v59 = vpop.f32.mrb[6].mxu1 }
 0x22d   :  { %v1335_v60 = vpop.f32.mrb[7].mxu1 }
 0x22e   :  { %v1336_v61 = vadd.f32 %v1335_v60, %v1334_v59  ;;  %v1064_v0 = vadd.f32 %v1333_v58, %v1274_v27 }
 0x230   :  { %v1067_v3 = vadd.f32 %v1336_v61, %v1274_v27 }
 0x24a   :  { %v1353_v62 = vpop.f32.mrb[8].mxu1 }
 0x24b   :  { %v1354_v63 = vpop.f32.mrb[9].mxu1 }
 0x24c   :  { %v1355_v1 = vadd.f32 %v1354_v63, %v1353_v62  ;;  %v1356_v2 = vpop.f32.mrb[10].mxu1 }
 0x24d   :  { %v1357_v6 = vpop.f32.mrb[11].mxu1 }
 0x24e   :  { %v1358_v4 = vadd.f32 %v1357_v6, %v1356_v2  ;;  %v1105_v5 = vadd.f32 %v1355_v1, %v1064_v0 }
 0x250   :  { %v1145_v7 = vpop.f32.mrb[8].mxu0  ;;  %v1108_v8 = vadd.f32 %v1358_v4, %v1067_v3 }
 0x251   :  { %v1146_v9 = vadd.f32 %v1145_v7, %v1105_v5  ;;  %v1388_v10 = vpop.f32.mrb[9].mxu0 }
 0x252   :  { %v1148_v11 = vpop.f32.mrb[10].mxu0 }
 0x253   :  { %v1154_v12 = vmul.f32 0.22916667, %v1146_v9  ;;  %v1149_v13 = vadd.f32 %v1148_v11, %v1108_v8  ;;  %v1389_v14 = vpop.f32.mrb[11].mxu0  ;;  %vm1152_vm12 = vcmp.ge.f32.partialorder %v1146_v9, 0.0 }
 0x255   :  { %vm1153_vm13 = vcmp.ge.f32.partialorder %v1149_v13, 0.0  ;;  %v1155_v15 = vmul.f32 0.22916667, %v1149_v13  ;;  %v1156_v17 = vsel %vm1152_vm12, %v1146_v9, %v1154_v12 }
 0x257   :  { %v1157_v19 = vsel %vm1153_vm13, %v1149_v13, %v1155_v15 }
 0x258   :  { %v1159_v20 = vpack.c.bf16 %v1157_v19, %v1156_v17 }
 0x25a   :  { %1391 = vmatpush3.bf16.xpose.msra.mxu1 %v1159_v20 }
 0x261   :  { %1393 = vmatmul.mubr.bf16.vlgmr.msra.gmra.mrb[12].mxu1 %v1158_v23 }
 0x334   :  { %v1194_v24 = vpop.f32.mrb[12].mxu1 }
 0x335   :  { %v1394_v25 = vpop.f32.mrb[13].mxu1  ;;  %1201 = vst.msk [vmem:[#allocation10] sm:$0xff] %vm1200_vm14, %v1194_v24 }
 0x336   :  { %v1197_v26 = vpop.f32.mrb[14].mxu1 }
 0x337   :  { %1622 = shalt.err (!%p1619_p8)
}
 0x338   :  { %s1623_s8 = scalar_lea.hbm %s1852_s9, 128 }
 0x339   :  { %p1624_p9 = scmp.ne.s32.totalorder %s1852_s9, %s1623_s8  ;;  %p1627_p10 = scmp.lt.u32.totalorder %s1623_s8, %s1852_s9 }
 0x33b   :  { %p1629_p11 = pnand %p1627_p10, %p1624_p9 }
 0x33d   :  { %1632 = shalt.err (!%p1629_p11)
}
 0x33e   :  { %1211 = dma.vmem_to_hbm [thread:$0]  %s1209_s25, 128, %s1852_s9, [#allocation4]   ;;  %v1395_v28 = vpop.f32.mrb[15].mxu1 }
 0x33f   :  { %1639 = dma.done.wait [#allocation4], 128  }
 0x340   :  { %1640 = vsyncadd [#allocation4], 4294967168 }
 0x341   :  { %1215 = vsyncpa [#allocation3], 1 }
 0x342   :  { %1216 = vsyncpa [#allocation6], 1 }
 0x343   :  { %1217 = vsyncpa [#allocation9], 1 }
 0x344   :  { %1218 = vsyncpa [#allocation4], 1 }

</bundles_post_ra>
